<compile_context>
chip_gen: v7x
topology: tpu7x:2x2x1
jax: 0.10.0
libtpu: 0.0.40
codegen_flags: <defaults>
</compile_context>

<pallas_src>
import jax
import jax.numpy as jnp
from jax.experimental import pallas as pl
from jax.experimental.pallas import tpu as pltpu


def _patch_embed_kernel(patches_ref, w_ref, b_ref, o_ref):
    # patches_ref: (tm, Kp) streamed   w_ref: (Kp, E) VMEM-resident
    # b_ref: (1, E) f32                o_ref: (tm, E)
    acc = jnp.dot(patches_ref[...], w_ref[...],
                  preferred_element_type=jnp.float32)
    o_ref[...] = (acc + b_ref[...]).astype(o_ref.dtype)


def prepare_patch_embed_params(weight, bias, *, data_format="NCHW",
                               compute_dtype=jnp.bfloat16):
    """One-time conv-weight relayout -> ((K, E) matrix, (1, E) f32 bias row).

    Hoist this out of the hot path (call once at init) to avoid a per-forward
    XLA transpose + K*E HBM write.  The K ordering must match data_format.
    """
    E, C, kh, kw = weight.shape
    K = C * kh * kw
    if data_format == "NCHW":
        w_mat = weight.reshape(E, K).T                       # K order (C, kh, kw)
    elif data_format == "NHWC":
        w_mat = weight.transpose(2, 3, 1, 0).reshape(K, E)   # K order (kh, kw, C)
    else:
        raise ValueError(f"unsupported data_format: {data_format!r}")
    return w_mat.astype(compute_dtype), bias.reshape(1, E).astype(jnp.float32)


def patch_embed_generic(x, weight, bias, patch_size=None, *,
                        data_format="NCHW", tm=1024,
                        compute_dtype=jnp.bfloat16, out_dtype=None,
                        w_mat=None, b_row=None, min_grid_steps=4):
    """PatchEmbedGeneric forward for a stride==kernel Conv2d patchify stem.

    x:      (B, C, H, W) for data_format="NCHW" (torch layout) or
            (B, H, W, C) for "NHWC" (cheaper XLA-side patchify).
    weight: (E, C, kh, kw) conv weight (OIHW);  bias: (E,).
    Returns (B, num_patches, E) == proj(x).flatten(2).transpose(1, 2).

    compute_dtype: matmul *input* dtype (default bfloat16 -- MXU-native on all
        TPU generations and halves streamed HBM bytes).  Accumulation is
        always f32, so results are bf16-input-accurate, not bitwise equal to
        an f32 conv; pass jnp.float32 for an exact f32 GEMM.
    out_dtype:     output dtype (default: x.dtype); bf16 halves output writes.
    w_mat, b_row:  optional pre-laid-out (K, E) weight / (1, E) f32 bias from
        prepare_patch_embed_params() -- hoist out of hot loops.
    tm:            max patch-matrix rows per grid step; sublane-aligned,
        capped to give >= min_grid_steps grid steps, shrunk to fit VMEM.
    """
    E, C, kh, kw = weight.shape
    if patch_size is not None:
        ps = ((int(patch_size), int(patch_size)) if isinstance(patch_size, int)
              else tuple(int(p) for p in patch_size))
        if ps != (kh, kw):
            raise ValueError(f"patch_size {ps} != conv kernel size {(kh, kw)}")

    if data_format == "NCHW":
        B, Cx, H, W = x.shape
    elif data_format == "NHWC":
        B, H, W, Cx = x.shape
    else:
        raise ValueError(f"unsupported data_format: {data_format!r}")
    assert Cx == C and H % kh == 0 and W % kw == 0
    Hp, Wp = H // kh, W // kw
    P = Hp * Wp
    M = B * P
    K = C * kh * kw

    cdt = jnp.dtype(compute_dtype)
    odt = jnp.dtype(out_dtype) if out_dtype is not None else x.dtype
    in_sz = cdt.itemsize
    out_sz = jnp.dtype(odt).itemsize

    # --- layout plumbing (XLA): extract non-overlapping patches in the conv
    # output order (b, hp, wp), flattened over the kernel footprint to match
    # the (K, E) weight layout; the compute-dtype cast fuses into the same
    # pass.  NHWC moves contiguous kw*C chunks (streams near HBM BW); NCHW is
    # the torch layout but a finer-grained relayout.
    # TODO(synk): fuse the patchify into the kernel (DMA (C, kh, W) strips of
    # x per grid step) to remove the (M, K) HBM round trip; a BlockSpec on x
    # needs kh % 8 == 0 and the in-kernel high-rank transpose lowers fragilely
    # for small kh/kw, so it is kept in XLA here.
    if data_format == "NCHW":
        patches = x.reshape(B, C, Hp, kh, Wp, kw).transpose(0, 2, 4, 1, 3, 5)
    else:
        patches = x.reshape(B, Hp, kh, Wp, kw, C).transpose(0, 1, 3, 2, 4, 5)
    patches = patches.reshape(M, K).astype(cdt)

    if w_mat is None or b_row is None:
        w_mat, b_row = prepare_patch_embed_params(
            weight, bias, data_format=data_format, compute_dtype=cdt)
    assert w_mat.shape == (K, E) and b_row.shape == (1, E)
    w_mat = w_mat.astype(cdt)
    b_row = b_row.astype(jnp.float32)

    # --- zero-pad K to a lane multiple (128); zero weight rows keep results exact.
    Kp = K if K % 128 == 0 else ((K + 127) // 128) * 128
    if Kp != K:
        patches = jnp.pad(patches, ((0, 0), (0, Kp - K)))
        w_mat = jnp.pad(w_mat, ((0, Kp - K), (0, 0)))

    # --- M tiling: sublane-aligned for the packed compute dtype, capped so the
    # grid has >= min_grid_steps steps (keeps both v7x TCs busy + pipelined).
    sub = 8 * max(1, 4 // in_sz)            # 8 (f32) / 16 (bf16) / 32 (int8, fp8)
    if M <= sub:
        tm_eff = M
    else:
        cap = max(sub, (pl.cdiv(M, int(min_grid_steps)) // sub) * sub)
        tm_eff = max(sub, (min(int(tm), cap, M) // sub) * sub)

    # --- honest VMEM budget: counts the default double buffer on every input
    # (even if the resident weight ends up single-buffered) plus Mosaic scratch
    # headroom; shrink tm if it would not fit the 48 MiB cap (v7x: 64 MiB/TC).
    def _buffers_bytes(tm_val):
        return (2 * tm_val * Kp * in_sz             # streamed patch tiles
                + 2 * tm_val * E * out_sz           # output tiles
                + 2 * (Kp * E * in_sz + 8 * E * 4)) # resident weight + bias

    budget = 44 * 1024 * 1024
    while tm_eff > sub and _buffers_bytes(tm_eff) > budget:
        tm_eff = max(sub, (tm_eff // 2 // sub) * sub)
    nm = pl.cdiv(M, tm_eff)
    vmem_limit = int(min(48 * 1024 * 1024,
                         max(16 * 1024 * 1024,
                             _buffers_bytes(tm_eff) + 4 * 1024 * 1024)))

    cost = pl.CostEstimate(
        flops=2 * M * Kp * E,
        transcendentals=0,
        bytes_accessed=M * Kp * in_sz + Kp * E * in_sz + M * E * out_sz)

    def _build(single_buffer_resident):
        res_kw = ({"pipeline_mode": pl.Buffered(1)}
                  if single_buffer_resident else {})
        return pl.pallas_call(
            _patch_embed_kernel,
            out_shape=jax.ShapeDtypeStruct((M, E), odt),
            grid=(nm,),
            in_specs=[
                pl.BlockSpec((tm_eff, Kp), lambda i: (i, 0)),       # streamed
                pl.BlockSpec((Kp, E), lambda i: (0, 0), **res_kw),  # resident
                pl.BlockSpec((1, E), lambda i: (0, 0), **res_kw),   # resident
            ],
            out_specs=pl.BlockSpec((tm_eff, E), lambda i: (i, 0)),
            compiler_params=pltpu.CompilerParams(
                dimension_semantics=("parallel",),
                vmem_limit_bytes=vmem_limit),
            cost_estimate=cost,
        )

    try:
        out = _build(True)(patches, w_mat, b_row)
    except Exception:
        # pl.Buffered(1) not accepted by this Pallas version; fall back to the
        # default double-buffered resident weight (already in the VMEM budget).
        out = _build(False)(patches, w_mat, b_row)

    # (B, num_patches, E) == flatten(2).transpose(1, 2) of the NCHW conv out.
    return out.reshape(B, P, E)


def _conv_reference(x_nchw, weight, bias):
    B, C, H, W = x_nchw.shape
    E, _, kh, kw = weight.shape
    ref = jax.lax.conv_general_dilated(
        x_nchw, weight, window_strides=(kh, kw), padding="VALID",
        dimension_numbers=("NCHW", "OIHW", "NCHW"))
    ref = ref + bias[None, :, None, None]
    return ref.reshape(B, E, -1).transpose(0, 2, 1)


if __name__ == "__main__":
    key = jax.random.PRNGKey(0)

    # 1) Exact f32 GEMM at the module's small spec shapes (K=64 -> padded 128).
    B, C, H, W, kh, kw, E = 2, 4, 16, 16, 4, 4, 32
    k1, k2, k3, key = jax.random.split(key, 4)
    x = jax.random.normal(k1, (B, C, H, W), jnp.float32)
    w = jax.random.normal(k2, (E, C, kh, kw), jnp.float32) / (C * kh * kw) ** 0.5
    b = jax.random.normal(k3, (E,), jnp.float32) * 0.01

    out = jax.block_until_ready(
        patch_embed_generic(x, w, b, (kh, kw), compute_dtype=jnp.float32))
    ref = _conv_reference(x, w, b)
    assert out.shape == (B, (H // kh) * (W // kw), E)
    assert jnp.allclose(out, ref, atol=1e-4, rtol=1e-4)

    # 2) Default bf16 compute, lane-dense E=128, ragged last M tile, padded K.
    B, C, H, W, kh, kw, E = 2, 3, 20, 20, 4, 4, 128
    k1, k2, k3, key = jax.random.split(key, 4)
    x = jax.random.normal(k1, (B, C, H, W), jnp.float32)
    w = jax.random.normal(k2, (E, C, kh, kw), jnp.float32) / (C * kh * kw) ** 0.5
    b = jax.random.normal(k3, (E,), jnp.float32) * 0.01

    out = jax.block_until_ready(patch_embed_generic(x, w, b, (kh, kw), tm=16))
    ref = _conv_reference(x, w, b)
    assert out.shape == (B, (H // kh) * (W // kw), E)
    assert jnp.allclose(out, ref, atol=1e-1, rtol=5e-2)

    # 3) NHWC fast path + hoisted weight relayout + bf16 output dtype.
    x_nhwc = x.transpose(0, 2, 3, 1)
    w_mat, b_row = prepare_patch_embed_params(w, b, data_format="NHWC")
    out3 = jax.block_until_ready(
        patch_embed_generic(x_nhwc, w, b, (kh, kw), data_format="NHWC",
                            out_dtype=jnp.bfloat16, w_mat=w_mat, b_row=b_row))
    assert out3.shape == ref.shape and out3.dtype == jnp.bfloat16
    assert jnp.allclose(out3.astype(jnp.float32), ref, atol=1e-1, rtol=5e-2)

    print("KERNEL_OK")
</pallas_src>

<mosaic_0001>
module attributes {stable_mosaic.version = 11 : i64} {
  func.func @_patch_embed_kernel(%arg0: i32, %arg1: memref<8x128xf32, #tpu.memory_space<vmem>>, %arg2: memref<128x32xf32, #tpu.memory_space<vmem>>, %arg3: memref<1x32xf32, #tpu.memory_space<vmem>>, %arg4: memref<8x32xf32, #tpu.memory_space<vmem>>) attributes {dimension_semantics = [#tpu.dimension_semantics<parallel>], iteration_bounds = array<i64: 4>, scalar_prefetch = 0 : i64, scratch_operands = 0 : i64, tpu.core_type = #tpu.core_type<tc>, window_params = [{transform_indices = @transform_0, window_bounds = array<i64: 8, 128>}, {pipeline_mode = #tpu.pipeline_mode<synchronous>, transform_indices = @transform_1, window_bounds = array<i64: 128, 32>}, {pipeline_mode = #tpu.pipeline_mode<synchronous>, transform_indices = @transform_2, window_bounds = array<i64: 1, 32>}, {transform_indices = @transform_3, window_bounds = array<i64: 8, 32>}]} {
    %c0 = arith.constant 0 : index
    %c0_0 = arith.constant 0 : index
    %0 = vector.load %arg1[%c0, %c0_0] : memref<8x128xf32, #tpu.memory_space<vmem>>, vector<8x128xf32>
    %c0_1 = arith.constant 0 : index
    %c0_2 = arith.constant 0 : index
    %1 = vector.load %arg2[%c0_1, %c0_2] : memref<128x32xf32, #tpu.memory_space<vmem>>, vector<128x32xf32>
    %cst = arith.constant dense<0.000000e+00> : vector<8x32xf32>
    %2 = tpu.matmul %0, %1, %cst {dimension_numbers = #tpu.dot_dimension_numbers<[1], [0], [0], [1], [0, 0, 1, 1], [], []>} : vector<8x128xf32>, vector<128x32xf32>, vector<8x32xf32> -> vector<8x32xf32>
    %c0_3 = arith.constant 0 : index
    %c0_4 = arith.constant 0 : index
    %3 = vector.load %arg3[%c0_3, %c0_4] : memref<1x32xf32, #tpu.memory_space<vmem>>, vector<1x32xf32>
    %4 = vector.broadcast %3 : vector<1x32xf32> to vector<8x32xf32>
    %5 = arith.addf %2, %4 : vector<8x32xf32>
    %c0_5 = arith.constant 0 : index
    %c0_6 = arith.constant 0 : index
    %6 = vector.load %arg4[%c0_5, %c0_6] : memref<8x32xf32, #tpu.memory_space<vmem>>, vector<8x32xf32>
    tpu.vector_store %arg4[%c0_5, %c0_6], %5 {strides = array<i32>} : memref<8x32xf32, #tpu.memory_space<vmem>>, vector<8x32xf32>,
    return
  }
  func.func @transform_0(%arg0: i32) -> (i32, i32) {
    %c0_i32 = arith.constant 0 : i32
    %c0_i32_0 = arith.constant 0 : i32
    return %arg0, %c0_i32 : i32, i32
  }
  func.func @transform_1(%arg0: i32) -> (i32, i32) {
    %c0_i32 = arith.constant 0 : i32
    %c0_i32_0 = arith.constant 0 : i32
    %c0_i32_1 = arith.constant 0 : i32
    return %c0_i32, %c0_i32_0 : i32, i32
  }
  func.func @transform_2(%arg0: i32) -> (i32, i32) {
    %c0_i32 = arith.constant 0 : i32
    %c0_i32_0 = arith.constant 0 : i32
    %c0_i32_1 = arith.constant 0 : i32
    return %c0_i32, %c0_i32_0 : i32, i32
  }
  func.func @transform_3(%arg0: i32) -> (i32, i32) {
    %c0_i32 = arith.constant 0 : i32
    %c0_i32_0 = arith.constant 0 : i32
    return %arg0, %c0_i32 : i32, i32
  }
}

module attributes {stable_mosaic.version = 11 : i64} {
  func.func @_patch_embed_kernel(%arg0: i32, %arg1: memref<8x128xf32, #tpu.memory_space<vmem>>, %arg2: memref<128x32xf32, #tpu.memory_space<vmem>>, %arg3: memref<1x32xf32, #tpu.memory_space<vmem>>, %arg4: memref<8x32xf32, #tpu.memory_space<vmem>>) attributes {dimension_semantics = [#tpu.dimension_semantics<parallel>], iteration_bounds = array<i64: 4>, scalar_prefetch = 0 : i64, scratch_operands = 0 : i64, tpu.core_type = #tpu.core_type<tc>, window_params = [{transform_indices = @transform_0, window_bounds = array<i64: 8, 128>}, {pipeline_mode = #tpu.pipeline_mode<synchronous>, transform_indices = @transform_1, window_bounds = array<i64: 128, 32>}, {pipeline_mode = #tpu.pipeline_mode<synchronous>, transform_indices = @transform_2, window_bounds = array<i64: 1, 32>}, {transform_indices = @transform_3, window_bounds = array<i64: 8, 32>}]} {
    %c0 = arith.constant 0 : index
    %c0_0 = arith.constant 0 : index
    %0 = vector.load %arg1[%c0, %c0_0] : memref<8x128xf32, #tpu.memory_space<vmem>>, vector<8x128xf32>
    %c0_1 = arith.constant 0 : index
    %c0_2 = arith.constant 0 : index
    %1 = vector.load %arg2[%c0_1, %c0_2] : memref<128x32xf32, #tpu.memory_space<vmem>>, vector<128x32xf32>
    %cst = arith.constant dense<0.000000e+00> : vector<8x32xf32>
    %2 = tpu.matmul %0, %1, %cst {dimension_numbers = #tpu.dot_dimension_numbers<[1], [0], [0], [1], [0, 0, 1, 1], [], []>} : vector<8x128xf32>, vector<128x32xf32>, vector<8x32xf32> -> vector<8x32xf32>
    %c0_3 = arith.constant 0 : index
    %c0_4 = arith.constant 0 : index
    %3 = vector.load %arg3[%c0_3, %c0_4] : memref<1x32xf32, #tpu.memory_space<vmem>>, vector<1x32xf32>
    %4 = vector.broadcast %3 : vector<1x32xf32> to vector<8x32xf32>
    %5 = arith.addf %2, %4 : vector<8x32xf32>
    %c0_5 = arith.constant 0 : index
    %c0_6 = arith.constant 0 : index
    %6 = vector.load %arg4[%c0_5, %c0_6] : memref<8x32xf32, #tpu.memory_space<vmem>>, vector<8x32xf32>
    tpu.vector_store %arg4[%c0_5, %c0_6], %5 {strides = array<i32>} : memref<8x32xf32, #tpu.memory_space<vmem>>, vector<8x32xf32>,
    return
  }
  func.func @transform_0(%arg0: i32) -> (i32, i32) {
    %c0_i32 = arith.constant 0 : i32
    %c0_i32_0 = arith.constant 0 : i32
    return %arg0, %c0_i32 : i32, i32
  }
  func.func @transform_1(%arg0: i32) -> (i32, i32) {
    %c0_i32 = arith.constant 0 : i32
    %c0_i32_0 = arith.constant 0 : i32
    %c0_i32_1 = arith.constant 0 : i32
    return %c0_i32, %c0_i32_0 : i32, i32
  }
  func.func @transform_2(%arg0: i32) -> (i32, i32) {
    %c0_i32 = arith.constant 0 : i32
    %c0_i32_0 = arith.constant 0 : i32
    %c0_i32_1 = arith.constant 0 : i32
    return %c0_i32, %c0_i32_0 : i32, i32
  }
  func.func @transform_3(%arg0: i32) -> (i32, i32) {
    %c0_i32 = arith.constant 0 : i32
    %c0_i32_0 = arith.constant 0 : i32
    return %arg0, %c0_i32 : i32, i32
  }
}

</mosaic_0001>

<bundles_post_ra>
// kernel: tpu_custom_call.1
= control target key start
LH: loop header
LB: loop body
LE: loop exit
PB: predicated region body
PF: predicated region fallthrough
CT: control target
= control target key end

     0   :  { %8 = vsyncpa [#allocation3], 0  ;;  %s703_s0 = inlined_call_operand.vmem [shape: f32[32,128], index: 0, kind: input, shape index: {}]   ;;  %s704_s1 = inlined_call_operand.vmem [shape: f32[128,32], index: 1, kind: input, shape index: {}]   ;;  %s705_s2 = inlined_call_operand.vmem [shape: f32[1,32], index: 2, kind: input, shape index: {}]   ;;  %s706_s3 = inlined_call_operand.hbm [shape: f32[32,32], index: 3, kind: output, shape index: {}]  }
   0x1   :  { %10 = vsyncpa [#allocation3 + $0x1], 0  ;;  %s552_s12 = smov 0   ;;  %s554_s13 = smov 0  }
   0x2   :  { %s556_s14 = smov 0   ;;  %s558_s15 = smov 0  }
   0x3 LB: > { %s573_s16 = sadd.s32 4294967295, %s526_s15   ;;  %s335_s17 = sadd.s32 4294967294, %s526_s15   ;;  %s526_s15 = sphi %s558_s15, %s712_s15   ;;  %s522_s14 = sphi %s556_s14, %s711_s14   ;;  %s518_s13 = sphi %s554_s13, %s710_s13   ;;  %s514_s12 = sphi %s552_s12, %s709_s12  }
   0x4   : > { %s577_s18 = sadd.s32 1, %s526_s15   ;;  %s91_s19 = sadd.s32 1, %s522_s14 }
   0x5   : > { %s88_s20 = ssub.s32 %s526_s15, %s577_s18  ;;  %p101_p0 = scmp.ne.s32.totalorder %s522_s14, %s518_s13 }
   0x6   : > { %p89_p1 = scmp.eq.s32.totalorder %s88_s20, 0  ;;  %p102_p2 = scmp.eq.s32.totalorder %s573_s16, 3 }
   0x7   : > { %p107_p3 = scmp.ne.s32.totalorder %s518_s13, %s514_s12  ;;  %p108_p4 = scmp.eq.s32.totalorder %s335_s17, 3 }
   0x8   : > { %s588_s21 = scalar_select %p89_p1, %s522_s14, %s91_s19  }
   0x9   : > { %p590_p5 = por %p102_p2, %p101_p0  ;;  %p594_p6 = por %p108_p4, %p107_p3 }
   0xa   : > { %p338_p7 = scmp.ge.s32.totalorder %s526_s15, 1  ;;  %p139_p8 = scmp.lt.s32.totalorder %s526_s15, 5 }
   0xc   : > { %p140_p9 = pnand %p338_p7, %p139_p8 }
   0xd   : > { %v167_v0 = vld [vmem:[%s704_s1] sm:$0xff] (!%p140_p9)  ;;  %v168_v1 = vld [vmem:[%s704_s1 + $0x8] sm:$0xff] (!%p140_p9)  ;;  %v169_v2 = vld [vmem:[%s704_s1 + $0x10] sm:$0xff] (!%p140_p9)  ;;  %v528_v3 = vmov (!%p140_p9), 0.0|0.0   ;;  %vm529_vm0 = vmmov (!%p140_p9), 0   ;;  %v530_v6 = vmov (!%p140_p9), 0.0  }
   0xe   : > { %143 = sbr.rel (%p140_p9) target bundleno = 275 (0x113), region = 32  ;;  %398 = vmatprep.subr.bf16.mxu0 (!%p140_p9), %v528_v3  ;;  %v399_v4 = vpack.c.bf16 (!%p140_p9), %v168_v1, %v167_v0  ;;  %v170_v5 = vld [vmem:[%s704_s1 + $0x18] sm:$0xff] (!%p140_p9)  ;;  %395 = vmatprep.mubr.msk.f32.mxu0 (!%p140_p9), %vm529_vm0, %v530_v6  ;;  %v171_v8 = vld [vmem:[%s704_s1 + $0x20] sm:$0xff] (!%p140_p9)  ;;  %v172_v9 = vld [vmem:[%s704_s1 + $0x28] sm:$0xff] (!%p140_p9)  ;;  %p162_p10 = scmp.lt.s32.totalorder (!%p140_p9), %s573_s16, 3  ;;  %vm260_vm1 = vcmask (!%p140_p9), 261120  }
   0xf   : > { %v402_v7 = vpack.c.bf16 (!%p140_p9), %v170_v5, %v169_v2  ;;  %v405_v10 = vpack.c.bf16 (!%p140_p9), %v172_v9, %v171_v8  ;;  %v173_v11 = vld [vmem:[%s704_s1 + $0x30] sm:$0xff] (!%p140_p9)  ;;  %v174_v12 = vld [vmem:[%s704_s1 + $0x38] sm:$0xff] (!%p140_p9)  ;;  %v175_v14 = vld [vmem:[%s704_s1 + $0x40] sm:$0xff] (!%p140_p9)  ;;  %s159_s25 = sand.u32 (!%p140_p9), 1, %s518_s13   ;;  %s343_s29 = sshll.u32 (!%p140_p9), %s573_s16, 7 }
  0x10   : > { %400 = vmatpush3.bf16.msra.mxu0 (!%p140_p9), %v399_v4  ;;  %v408_v13 = vpack.c.bf16 (!%p140_p9), %v174_v12, %v173_v11  ;;  %v176_v15 = vld [vmem:[%s704_s1 + $0x48] sm:$0xff] (!%p140_p9)  ;;  %v177_v17 = vld [vmem:[%s704_s1 + $0x50] sm:$0xff] (!%p140_p9)  ;;  %v178_v18 = vld [vmem:[%s704_s1 + $0x58] sm:$0xff] (!%p140_p9)  ;;  %s339_s26 = sshll.u32 (!%p140_p9), %s159_s25, 3  ;;  %s263_s8 = scalar_lea.sflag (!%p140_p9), [#allocation3], %s159_s25 }
  0x11   : > { %401 = vmatprep.subr.bf16.mxu0 (!%p140_p9), %v528_v3  ;;  %v411_v16 = vpack.c.bf16 (!%p140_p9), %v176_v15, %v175_v14  ;;  %v414_v19 = vpack.c.bf16 (!%p140_p9), %v178_v18, %v177_v17  ;;  %v179_v20 = vld [vmem:[%s704_s1 + $0x60] sm:$0xff] (!%p140_p9)  ;;  %v180_v21 = vld [vmem:[%s704_s1 + $0x68] sm:$0xff] (!%p140_p9)  ;;  %v181_v23 = vld [vmem:[%s704_s1 + $0x70] sm:$0xff] (!%p140_p9)  ;;  %s161_s30 = scalar_lea.vmem (!%p140_p9), [#allocation2], %s339_s26 }
  0x12   : > { %v417_v22 = vpack.c.bf16 (!%p140_p9), %v180_v21, %v179_v20  ;;  %v182_v24 = vld [vmem:[%s704_s1 + $0x78] sm:$0xff] (!%p140_p9)  ;;  %v341_v27 = vld [vmem:[%s705_s2] ss:$0 sm:$0xff] (!%p140_p9)  ;;  %s276_s4 = sshll.u32 (!%p140_p9), %s161_s30, 4  ;;  %s663_s4 = int_to_ptr.vmem [resolvable:$true] %s276_s4 }
  0x13   : > { %v420_v25 = vpack.c.bf16 (!%p140_p9), %v182_v24, %v181_v23  ;;  %s464_s9 = scalar_lea.vmem (!%p140_p9), %s663_s4, 128 }
  0x14   : > { %403 = vmatpush3.bf16.msra.mxu0 (!%p140_p9), %v402_v7  ;;  %p465_p11 = scmp.ne.s32.totalorder (!%p140_p9), %s663_s4, %s464_s9 }
  0x15   : > { %404 = vmatprep.subr.bf16.mxu0 %v528_v3  ;;  %s163_s7 = scalar_select %p162_p10, %s573_s16, 3 }
  0x16   : > { %p466_p12 = pnand %p465_p11, %p590_p5  ;;  %s531_s16 = smov [#allocation2]  }
  0x17   : > { %s340_s17 = sshll.u32 %s163_s7, 3  ;;  %s661_s7 = scalar_lea.hbm %s706_s3, %s343_s29 }
  0x18   : > { %406 = vmatpush3.bf16.msra.mxu0 %v405_v10  ;;  %s165_s24 = scalar_lea.vmem %s703_s0, %s340_s17  ;;  %p467_p13 = pneg %p466_p12 }
  0x19   : > { %407 = vmatprep.subr.bf16.mxu0 %v528_v3  ;;  %v166_v26 = vld [vmem:[%s165_s24] sm:$0xff]  ;;  %s468_s10 = sshll.u32 %s531_s16, 4  ;;  %s469_s10 = int_to_ptr.vmem [resolvable:$false] %s468_s10 }
  0x1a   : > { %s470_s11 = scalar_lea.vmem %s469_s10, 256  ;;  %p471_p0 = scmp.lt.s32.totalorder %s663_s4, %s469_s10 }
  0x1b   : > { %p472_p1 = scmp.lt.s32.totalorder %s470_s11, %s464_s9 }
  0x1c   : > { %409 = vmatpush3.bf16.msra.mxu0 %v408_v13 }
  0x1d   : > { %410 = vmatprep.subr.bf16.mxu0 %v528_v3  ;;  %p473_p2 = por %p472_p1, %p471_p0 }
  0x1f   : > { %p474_p3 = pnand %p473_p2, %p467_p13 }
  0x20   : > { %412 = vmatpush3.bf16.msra.mxu0 %v411_v16 }
  0x21   : > { %413 = vmatprep.subr.bf16.mxu0 %v528_v3 }
  0x24   : > { %415 = vmatpush3.bf16.msra.mxu0 %v414_v19 }
  0x25   : > { %416 = vmatprep.subr.bf16.mxu0 %v528_v3 }
  0x28   : > { %418 = vmatpush3.bf16.msra.mxu0 %v417_v22 }
  0x29   : > { %419 = vmatprep.subr.bf16.mxu0 %v528_v3 }
  0x2c   : > { %421 = vmatpush3.bf16.msra.mxu0 %v420_v25 }
  0x2f   : > { %396 = vmatmul.mubr.f32.vlgmr.msra.gmra.mrb[0].mxu0 %v166_v26 }
 0x102   : > { %v256_v28 = vpop.f32.mrb[0].mxu0 }
 0x103   : > { %v257_v29 = vadd.f32 %v341_v27, %v256_v28  ;;  %v397_v30 = vpop.f32.mrb[1].mxu0 }
 0x105   : > { %261 = vst.msk [vmem:[%s161_s30] sm:$0xff] %vm260_vm1, %v257_v29 }
 0x106   : > { %477 = shalt.err (!%p474_p3)
}
 0x107   : > { %s478_s17 = scalar_lea.hbm %s661_s7, 128  ;;  %s482_s24 = scalar_lea.hbm %s706_s3, 512 }
 0x108   : > { %p479_p4 = scmp.ne.s32.totalorder %s661_s7, %s478_s17  ;;  %p483_p9 = scmp.lt.u32.totalorder %s661_s7, %s706_s3 }
 0x109   : > { %p484_p10 = scmp.lt.u32.totalorder %s482_s24, %s478_s17  ;;  %p486_p12 = scmp.lt.u32.totalorder %s478_s17, %s661_s7 }
 0x10a   : > { %p480_p7 = pnand %p479_p4, %p590_p5 }
 0x10b   : > { %p485_p11 = por %p484_p10, %p483_p9 }
 0x10c   : > { %p481_p8 = pneg %p480_p7 }
 0x10d   : > { %p487_p13 = por %p486_p12, %p485_p11 }
 0x10f   : > { %p488_p0 = pnand %p487_p13, %p481_p8 }
 0x111   : > { %491 = shalt.err (!%p488_p0)
}
 0x112   : > { %422 = dma.vmem_to_hbm [thread:$0]  (%p590_p5), %s663_s4, 128, %s661_s7, %s263_s8  }
 0x113 PF: > { %p428_p1 = scmp.ge.s32.totalorder %s526_s15, 2  ;;  %s288_s27 = sand.u32 1, %s514_s12  }
 0x114   : > { %s289_s28 = scalar_lea.sflag [#allocation3], %s288_s27 }
 0x115   : > { %p425_p2 = pnand %p428_p1, %p594_p6 }
 0x117   : > { %509 = dma.done.wait (!%p425_p2), %s289_s28, 128  }
 0x118   : > { %511 = vsyncadd (!%p425_p2), %s289_s28, 4294967168  ;;  %p13_p3 = scmp.ge.s32.totalorder %s577_s18, 6   ;;  %s709_s12 = smov %s518_s13 }
 0x119   : > { %s710_s13 = smov %s522_s14  ;;  %s711_s14 = smov %s588_s21 }
 0x11a   : > { %s712_s15 = smov %s577_s18  ;;  %15 = sbr.rel (!%p13_p3) target bundleno = 3 (0x3), region = 67 }
 0x121   :  { %294 = vsyncpa [#allocation3], 1 }
 0x122   :  { %296 = vsyncpa [#allocation3 + $0x1], 1 }

// kernel: tpu_custom_call.1
= control target key start
LH: loop header
LB: loop body
LE: loop exit
PB: predicated region body
PF: predicated region fallthrough
CT: control target
= control target key end

     0   :  { %8 = vsyncpa [#allocation3], 0  ;;  %s703_s0 = inlined_call_operand.vmem [shape: f32[32,128], index: 0, kind: input, shape index: {}]   ;;  %s704_s1 = inlined_call_operand.vmem [shape: f32[128,32], index: 1, kind: input, shape index: {}]   ;;  %s705_s2 = inlined_call_operand.vmem [shape: f32[1,32], index: 2, kind: input, shape index: {}]   ;;  %s706_s3 = inlined_call_operand.hbm [shape: f32[32,32], index: 3, kind: output, shape index: {}]  }
   0x1   :  { %10 = vsyncpa [#allocation3 + $0x1], 0  ;;  %s552_s12 = smov 0   ;;  %s554_s13 = smov 0  }
   0x2   :  { %s556_s14 = smov 0   ;;  %s558_s15 = smov 0  }
   0x3 LB: > { %s573_s16 = sadd.s32 4294967295, %s526_s15   ;;  %s335_s17 = sadd.s32 4294967294, %s526_s15   ;;  %s526_s15 = sphi %s558_s15, %s712_s15   ;;  %s522_s14 = sphi %s556_s14, %s711_s14   ;;  %s518_s13 = sphi %s554_s13, %s710_s13   ;;  %s514_s12 = sphi %s552_s12, %s709_s12  }
   0x4   : > { %s577_s18 = sadd.s32 1, %s526_s15   ;;  %s91_s19 = sadd.s32 1, %s522_s14 }
   0x5   : > { %s88_s20 = ssub.s32 %s526_s15, %s577_s18  ;;  %p101_p0 = scmp.ne.s32.totalorder %s522_s14, %s518_s13 }
   0x6   : > { %p89_p1 = scmp.eq.s32.totalorder %s88_s20, 0  ;;  %p102_p2 = scmp.eq.s32.totalorder %s573_s16, 3 }
   0x7   : > { %p107_p3 = scmp.ne.s32.totalorder %s518_s13, %s514_s12  ;;  %p108_p4 = scmp.eq.s32.totalorder %s335_s17, 3 }
   0x8   : > { %s588_s21 = scalar_select %p89_p1, %s522_s14, %s91_s19  }
   0x9   : > { %p590_p5 = por %p102_p2, %p101_p0  ;;  %p594_p6 = por %p108_p4, %p107_p3 }
   0xa   : > { %p338_p7 = scmp.ge.s32.totalorder %s526_s15, 1  ;;  %p139_p8 = scmp.lt.s32.totalorder %s526_s15, 5 }
   0xc   : > { %p140_p9 = pnand %p338_p7, %p139_p8 }
   0xd   : > { %v167_v0 = vld [vmem:[%s704_s1] sm:$0xff] (!%p140_p9)  ;;  %v168_v1 = vld [vmem:[%s704_s1 + $0x8] sm:$0xff] (!%p140_p9)  ;;  %v169_v2 = vld [vmem:[%s704_s1 + $0x10] sm:$0xff] (!%p140_p9)  ;;  %v528_v3 = vmov (!%p140_p9), 0.0|0.0   ;;  %vm529_vm0 = vmmov (!%p140_p9), 0   ;;  %v530_v6 = vmov (!%p140_p9), 0.0  }
   0xe   : > { %143 = sbr.rel (%p140_p9) target bundleno = 275 (0x113), region = 32  ;;  %398 = vmatprep.subr.bf16.mxu0 (!%p140_p9), %v528_v3  ;;  %v399_v4 = vpack.c.bf16 (!%p140_p9), %v168_v1, %v167_v0  ;;  %v170_v5 = vld [vmem:[%s704_s1 + $0x18] sm:$0xff] (!%p140_p9)  ;;  %395 = vmatprep.mubr.msk.f32.mxu0 (!%p140_p9), %vm529_vm0, %v530_v6  ;;  %v171_v8 = vld [vmem:[%s704_s1 + $0x20] sm:$0xff] (!%p140_p9)  ;;  %v172_v9 = vld [vmem:[%s704_s1 + $0x28] sm:$0xff] (!%p140_p9)  ;;  %p162_p10 = scmp.lt.s32.totalorder (!%p140_p9), %s573_s16, 3  ;;  %vm260_vm1 = vcmask (!%p140_p9), 261120  }
   0xf   : > { %v402_v7 = vpack.c.bf16 (!%p140_p9), %v170_v5, %v169_v2  ;;  %v405_v10 = vpack.c.bf16 (!%p140_p9), %v172_v9, %v171_v8  ;;  %v173_v11 = vld [vmem:[%s704_s1 + $0x30] sm:$0xff] (!%p140_p9)  ;;  %v174_v12 = vld [vmem:[%s704_s1 + $0x38] sm:$0xff] (!%p140_p9)  ;;  %v175_v14 = vld [vmem:[%s704_s1 + $0x40] sm:$0xff] (!%p140_p9)  ;;  %s159_s25 = sand.u32 (!%p140_p9), 1, %s518_s13   ;;  %s343_s29 = sshll.u32 (!%p140_p9), %s573_s16, 7 }
  0x10   : > { %400 = vmatpush3.bf16.msra.mxu0 (!%p140_p9), %v399_v4  ;;  %v408_v13 = vpack.c.bf16 (!%p140_p9), %v174_v12, %v173_v11  ;;  %v176_v15 = vld [vmem:[%s704_s1 + $0x48] sm:$0xff] (!%p140_p9)  ;;  %v177_v17 = vld [vmem:[%s704_s1 + $0x50] sm:$0xff] (!%p140_p9)  ;;  %v178_v18 = vld [vmem:[%s704_s1 + $0x58] sm:$0xff] (!%p140_p9)  ;;  %s339_s26 = sshll.u32 (!%p140_p9), %s159_s25, 3  ;;  %s263_s8 = scalar_lea.sflag (!%p140_p9), [#allocation3], %s159_s25 }
  0x11   : > { %401 = vmatprep.subr.bf16.mxu0 (!%p140_p9), %v528_v3  ;;  %v411_v16 = vpack.c.bf16 (!%p140_p9), %v176_v15, %v175_v14  ;;  %v414_v19 = vpack.c.bf16 (!%p140_p9), %v178_v18, %v177_v17  ;;  %v179_v20 = vld [vmem:[%s704_s1 + $0x60] sm:$0xff] (!%p140_p9)  ;;  %v180_v21 = vld [vmem:[%s704_s1 + $0x68] sm:$0xff] (!%p140_p9)  ;;  %v181_v23 = vld [vmem:[%s704_s1 + $0x70] sm:$0xff] (!%p140_p9)  ;;  %s161_s30 = scalar_lea.vmem (!%p140_p9), [#allocation2], %s339_s26 }
  0x12   : > { %v417_v22 = vpack.c.bf16 (!%p140_p9), %v180_v21, %v179_v20  ;;  %v182_v24 = vld [vmem:[%s704_s1 + $0x78] sm:$0xff] (!%p140_p9)  ;;  %v341_v27 = vld [vmem:[%s705_s2] ss:$0 sm:$0xff] (!%p140_p9)  ;;  %s276_s4 = sshll.u32 (!%p140_p9), %s161_s30, 4  ;;  %s663_s4 = int_to_ptr.vmem [resolvable:$true] %s276_s4 }
  0x13   : > { %v420_v25 = vpack.c.bf16 (!%p140_p9), %v182_v24, %v181_v23  ;;  %s464_s9 = scalar_lea.vmem (!%p140_p9), %s663_s4, 128 }
  0x14   : > { %403 = vmatpush3.bf16.msra.mxu0 (!%p140_p9), %v402_v7  ;;  %p465_p11 = scmp.ne.s32.totalorder (!%p140_p9), %s663_s4, %s464_s9 }
  0x15   : > { %404 = vmatprep.subr.bf16.mxu0 %v528_v3  ;;  %s163_s7 = scalar_select %p162_p10, %s573_s16, 3 }
  0x16   : > { %p466_p12 = pnand %p465_p11, %p590_p5  ;;  %s531_s16 = smov [#allocation2]  }
  0x17   : > { %s340_s17 = sshll.u32 %s163_s7, 3  ;;  %s661_s7 = scalar_lea.hbm %s706_s3, %s343_s29 }
  0x18   : > { %406 = vmatpush3.bf16.msra.mxu0 %v405_v10  ;;  %s165_s24 = scalar_lea.vmem %s703_s0, %s340_s17  ;;  %p467_p13 = pneg %p466_p12 }
  0x19   : > { %407 = vmatprep.subr.bf16.mxu0 %v528_v3  ;;  %v166_v26 = vld [vmem:[%s165_s24] sm:$0xff]  ;;  %s468_s10 = sshll.u32 %s531_s16, 4  ;;  %s469_s10 = int_to_ptr.vmem [resolvable:$false] %s468_s10 }
  0x1a   : > { %s470_s11 = scalar_lea.vmem %s469_s10, 256  ;;  %p471_p0 = scmp.lt.s32.totalorder %s663_s4, %s469_s10 }
  0x1b   : > { %p472_p1 = scmp.lt.s32.totalorder %s470_s11, %s464_s9 }
  0x1c   : > { %409 = vmatpush3.bf16.msra.mxu0 %v408_v13 }
  0x1d   : > { %410 = vmatprep.subr.bf16.mxu0 %v528_v3  ;;  %p473_p2 = por %p472_p1, %p471_p0 }
  0x1f   : > { %p474_p3 = pnand %p473_p2, %p467_p13 }
  0x20   : > { %412 = vmatpush3.bf16.msra.mxu0 %v411_v16 }
  0x21   : > { %413 = vmatprep.subr.bf16.mxu0 %v528_v3 }
  0x24   : > { %415 = vmatpush3.bf16.msra.mxu0 %v414_v19 }
  0x25   : > { %416 = vmatprep.subr.bf16.mxu0 %v528_v3 }
  0x28   : > { %418 = vmatpush3.bf16.msra.mxu0 %v417_v22 }
  0x29   : > { %419 = vmatprep.subr.bf16.mxu0 %v528_v3 }
  0x2c   : > { %421 = vmatpush3.bf16.msra.mxu0 %v420_v25 }
  0x2f   : > { %396 = vmatmul.mubr.f32.vlgmr.msra.gmra.mrb[0].mxu0 %v166_v26 }
 0x102   : > { %v256_v28 = vpop.f32.mrb[0].mxu0 }
 0x103   : > { %v257_v29 = vadd.f32 %v341_v27, %v256_v28  ;;  %v397_v30 = vpop.f32.mrb[1].mxu0 }
 0x105   : > { %261 = vst.msk [vmem:[%s161_s30] sm:$0xff] %vm260_vm1, %v257_v29 }
 0x106   : > { %477 = shalt.err (!%p474_p3)
}
 0x107   : > { %s478_s17 = scalar_lea.hbm %s661_s7, 128  ;;  %s482_s24 = scalar_lea.hbm %s706_s3, 512 }
 0x108   : > { %p479_p4 = scmp.ne.s32.totalorder %s661_s7, %s478_s17  ;;  %p483_p9 = scmp.lt.u32.totalorder %s661_s7, %s706_s3 }
 0x109   : > { %p484_p10 = scmp.lt.u32.totalorder %s482_s24, %s478_s17  ;;  %p486_p12 = scmp.lt.u32.totalorder %s478_s17, %s661_s7 }
 0x10a   : > { %p480_p7 = pnand %p479_p4, %p590_p5 }
 0x10b   : > { %p485_p11 = por %p484_p10, %p483_p9 }
 0x10c   : > { %p481_p8 = pneg %p480_p7 }
 0x10d   : > { %p487_p13 = por %p486_p12, %p485_p11 }
 0x10f   : > { %p488_p0 = pnand %p487_p13, %p481_p8 }
 0x111   : > { %491 = shalt.err (!%p488_p0)
}
 0x112   : > { %422 = dma.vmem_to_hbm [thread:$0]  (%p590_p5), %s663_s4, 128, %s661_s7, %s263_s8  }
 0x113 PF: > { %p428_p1 = scmp.ge.s32.totalorder %s526_s15, 2  ;;  %s288_s27 = sand.u32 1, %s514_s12  }
 0x114   : > { %s289_s28 = scalar_lea.sflag [#allocation3], %s288_s27 }
 0x115   : > { %p425_p2 = pnand %p428_p1, %p594_p6 }
 0x117   : > { %509 = dma.done.wait (!%p425_p2), %s289_s28, 128  }
 0x118   : > { %511 = vsyncadd (!%p425_p2), %s289_s28, 4294967168  ;;  %p13_p3 = scmp.ge.s32.totalorder %s577_s18, 6   ;;  %s709_s12 = smov %s518_s13 }
 0x119   : > { %s710_s13 = smov %s522_s14  ;;  %s711_s14 = smov %s588_s21 }
 0x11a   : > { %s712_s15 = smov %s577_s18  ;;  %15 = sbr.rel (!%p13_p3) target bundleno = 3 (0x3), region = 67 }
 0x121   :  { %294 = vsyncpa [#allocation3], 1 }
 0x122   :  { %296 = vsyncpa [#allocation3 + $0x1], 1 }

</bundles_post_ra>
